<compile_context>
chip_gen: v6e
topology: v6e:2x2x1
jax: 0.10.0
libtpu: 0.0.40
codegen_flags: <defaults>
</compile_context>

<pallas_src>
import functools
import math

import jax
import jax.numpy as jnp
from jax.experimental import pallas as pl
from jax.experimental.pallas import tpu as pltpu

_LANES = 128
_SUBLANES = 8


def _round_up(x, m):
    return ((x + m - 1) // m) * m


def _make_kernel(thr):
    """Kernel closure over the (logit-space) threshold."""

    def kernel(pr_ref, gt_ref, tp_ref, sp_ref, sg_ref):
        j = pl.program_id(1)

        # Output blocks are revisited across the (arbitrary) j axis -> they act
        # as resident VMEM accumulators; zero them on the first reduction step.
        @pl.when(j == 0)
        def _():
            tp_ref[...] = jnp.zeros_like(tp_ref)
            sp_ref[...] = jnp.zeros_like(sp_ref)
            sg_ref[...] = jnp.zeros_like(sg_ref)

        # Activation + threshold folded into one compare (no transcendental):
        #   sigmoid(x) > t  <=>  x > log(t / (1 - t))
        pr_bin = (pr_ref[...].astype(jnp.float32) > thr).astype(jnp.float32)
        gt = gt_ref[...].astype(jnp.float32)

        tm = pr_ref.shape[0]
        k = tm // _SUBLANES
        # (tm,128) -> (tm//8, 8, 128) stays within (8,128) tiles; the axis-0
        # sum is plain VPU adds (no per-step cross-lane XLU reduce).
        tp_ref[...] += jnp.sum((gt * pr_bin).reshape(k, _SUBLANES, _LANES), axis=0)
        sp_ref[...] += jnp.sum(pr_bin.reshape(k, _SUBLANES, _LANES), axis=0)
        sg_ref[...] += jnp.sum(gt.reshape(k, _SUBLANES, _LANES), axis=0)

    return kernel


def fscore_metric(y_pr, y_gt, *, beta=1.0, eps=1e-7, threshold=0.5,
                  activation="sigmoid", tm_max=1024):
    """F-score metric. y_pr: raw logits; y_gt: ground truth, same shape."""
    assert y_pr.shape == y_gt.shape
    n = y_pr.size

    # Fold the activation into the threshold so the kernel only compares.
    if activation == "sigmoid":
        if threshold <= 0.0:
            thr = -float("inf")
        elif threshold >= 1.0:
            thr = float("inf")
        else:
            thr = math.log(threshold / (1.0 - threshold))  # 0.0 for t=0.5
    elif activation is None or activation == "none":
        thr = float(threshold)
    else:
        # TODO(synk): 'softmax2d' activation (cross-channel softmax) not implemented.
        raise NotImplementedError(f"activation={activation!r}")

    rows = pl.cdiv(n, _LANES)
    # Two-way shard of the row range for v7x megacore; single shard when tiny.
    num_shards = 2 if rows >= 2 * _SUBLANES else 1
    tm = max(_SUBLANES,
             min(tm_max, _round_up(pl.cdiv(rows, num_shards), _SUBLANES)))
    chunk = num_shards * tm
    rows_padded = _round_up(rows, chunk)
    blocks_per_shard = rows_padded // chunk

    pr_flat = y_pr.reshape(-1)
    gt_flat = y_gt.reshape(-1)
    pad = rows_padded * _LANES - n
    if pad:
        # Tail-only padding (no full-array pad/scatter pass).
        pad_val = min(thr - 1.0, 0.0)          # strictly below thr (handles +/-inf)
        pr_flat = jnp.concatenate(
            [pr_flat, jnp.full((pad,), pad_val, dtype=pr_flat.dtype)])
        gt_flat = jnp.concatenate(
            [gt_flat, jnp.zeros((pad,), dtype=gt_flat.dtype)])

    pr2d = pr_flat.reshape(rows_padded, _LANES)
    gt2d = gt_flat.reshape(rows_padded, _LANES)

    grid = (num_shards, blocks_per_shard)
    in_spec = pl.BlockSpec((tm, _LANES),
                           lambda i, j: (i * blocks_per_shard + j, 0))
    acc_shape = jax.ShapeDtypeStruct((num_shards, _SUBLANES, _LANES), jnp.float32)
    acc_spec = pl.BlockSpec((None, _SUBLANES, _LANES), lambda i, j: (i, 0, 0))

    tp_p, sp_p, sg_p = pl.pallas_call(
        _make_kernel(thr),
        out_shape=(acc_shape, acc_shape, acc_shape),
        grid_spec=pltpu.PrefetchScalarGridSpec(
            num_scalar_prefetch=0,
            grid=grid,
            in_specs=[in_spec, in_spec],
            out_specs=[acc_spec, acc_spec, acc_spec],
        ),
        compiler_params=pltpu.CompilerParams(
            dimension_semantics=("parallel", "arbitrary")),
    )(pr2d, gt2d)

    # Tiny final reductions + scalar math (fused when this wrapper is jitted).
    tp = jnp.sum(tp_p)
    fp = jnp.sum(sp_p) - tp
    fn = jnp.sum(sg_p) - tp
    b2 = beta * beta
    return ((1.0 + b2) * tp + eps) / ((1.0 + b2) * tp + b2 * fn + fp + eps)


def _fscore_reference(y_pr, y_gt, beta=1.0, eps=1e-7, threshold=0.5):
    pr = jax.nn.sigmoid(y_pr.astype(jnp.float32))
    pr = (pr > threshold).astype(jnp.float32)
    gt = y_gt.astype(jnp.float32)
    tp = jnp.sum(gt * pr)
    fp = jnp.sum(pr) - tp
    fn = jnp.sum(gt) - tp
    b2 = beta * beta
    return ((1.0 + b2) * tp + eps) / ((1.0 + b2) * tp + b2 * fn + fp + eps)


if __name__ == "__main__":
    key = jax.random.PRNGKey(0)
    k1, k2, k3, k4 = jax.random.split(key, 4)

    fscore = jax.jit(functools.partial(
        fscore_metric, beta=1.0, eps=1e-7, threshold=0.5))

    # NCHW, matching the PyTorch module's convention (raw logits + binary gt).
    B, C, H, W = 2, 4, 16, 16
    y_pr = jax.random.normal(k1, (B, C, H, W), dtype=jnp.float32)
    y_gt = (jax.random.uniform(k2, (B, C, H, W)) > 0.5).astype(jnp.float32)
    score = jax.block_until_ready(fscore(y_pr, y_gt))
    ref = _fscore_reference(y_pr, y_gt)
    assert jnp.allclose(score, ref, atol=1e-6, rtol=1e-6), (score, ref)

    # Ragged element count: exercises the tail-only padding path.
    y_pr2 = jax.random.normal(k3, (2, 3, 7, 5), dtype=jnp.float32)
    y_gt2 = (jax.random.uniform(k4, (2, 3, 7, 5)) > 0.5).astype(jnp.float32)
    score2 = jax.block_until_ready(fscore(y_pr2, y_gt2))
    ref2 = _fscore_reference(y_pr2, y_gt2)
    assert jnp.allclose(score2, ref2, atol=1e-6, rtol=1e-6), (score2, ref2)

    print("KERNEL_OK")
</pallas_src>

<mosaic_0001>
module attributes {stable_mosaic.version = 11 : i64} {
  func.func @kernel(%arg0: i32, %arg1: i32, %arg2: memref<8x128xf32, #tpu.memory_space<vmem>>, %arg3: memref<8x128xf32, #tpu.memory_space<vmem>>, %arg4: memref<1x8x128xf32, #tpu.memory_space<vmem>>, %arg5: memref<1x8x128xf32, #tpu.memory_space<vmem>>, %arg6: memref<1x8x128xf32, #tpu.memory_space<vmem>>) attributes {dimension_semantics = [#tpu.dimension_semantics<parallel>, #tpu.dimension_semantics<arbitrary>], iteration_bounds = array<i64: 2, 1>, scalar_prefetch = 0 : i64, scratch_operands = 0 : i64, tpu.core_type = #tpu.core_type<tc>, window_params = [{transform_indices = @transform_0, window_bounds = array<i64: 8, 128>}, {transform_indices = @transform_1, window_bounds = array<i64: 8, 128>}, {transform_indices = @transform_2, window_bounds = array<i64: 1, 8, 128>}, {transform_indices = @transform_3, window_bounds = array<i64: 1, 8, 128>}, {transform_indices = @transform_4, window_bounds = array<i64: 1, 8, 128>}]} {
    %c0_i32 = arith.constant 0 : i32
    %0 = arith.cmpi eq, %arg1, %c0_i32 : i32
    %1 = arith.extui %0 : i1 to i32
    %c0_i32_0 = arith.constant 0 : i32
    %2 = arith.cmpi ne, %1, %c0_i32_0 : i32
    scf.if %2 {
      %cst_25 = arith.constant 0.000000e+00 : f32
      %34 = vector.broadcast %cst_25 : f32 to vector<8x128xf32>
      %c0_26 = arith.constant 0 : index
      %c0_27 = arith.constant 0 : index
      %c0_28 = arith.constant 0 : index
      %35 = vector.load %arg4[%c0_26, %c0_27, %c0_28] : memref<1x8x128xf32, #tpu.memory_space<vmem>>, vector<1x8x128xf32>
      %36 = vector.shape_cast %35 : vector<1x8x128xf32> to vector<8x128xf32>
      %37 = vector.shape_cast %34 : vector<8x128xf32> to vector<1x8x128xf32>
      tpu.vector_store %arg4[%c0_26, %c0_27, %c0_28], %37 {strides = array<i32>} : memref<1x8x128xf32, #tpu.memory_space<vmem>>, vector<1x8x128xf32>,
      %cst_29 = arith.constant 0.000000e+00 : f32
      %38 = vector.broadcast %cst_29 : f32 to vector<8x128xf32>
      %c0_30 = arith.constant 0 : index
      %c0_31 = arith.constant 0 : index
      %c0_32 = arith.constant 0 : index
      %39 = vector.load %arg5[%c0_30, %c0_31, %c0_32] : memref<1x8x128xf32, #tpu.memory_space<vmem>>, vector<1x8x128xf32>
      %40 = vector.shape_cast %39 : vector<1x8x128xf32> to vector<8x128xf32>
      %41 = vector.shape_cast %38 : vector<8x128xf32> to vector<1x8x128xf32>
      tpu.vector_store %arg5[%c0_30, %c0_31, %c0_32], %41 {strides = array<i32>} : memref<1x8x128xf32, #tpu.memory_space<vmem>>, vector<1x8x128xf32>,
      %cst_33 = arith.constant 0.000000e+00 : f32
      %42 = vector.broadcast %cst_33 : f32 to vector<8x128xf32>
      %c0_34 = arith.constant 0 : index
      %c0_35 = arith.constant 0 : index
      %c0_36 = arith.constant 0 : index
      %43 = vector.load %arg6[%c0_34, %c0_35, %c0_36] : memref<1x8x128xf32, #tpu.memory_space<vmem>>, vector<1x8x128xf32>
      %44 = vector.shape_cast %43 : vector<1x8x128xf32> to vector<8x128xf32>
      %45 = vector.shape_cast %42 : vector<8x128xf32> to vector<1x8x128xf32>
      tpu.vector_store %arg6[%c0_34, %c0_35, %c0_36], %45 {strides = array<i32>} : memref<1x8x128xf32, #tpu.memory_space<vmem>>, vector<1x8x128xf32>,
    } else {
    }
    %c0 = arith.constant 0 : index
    %c0_1 = arith.constant 0 : index
    %3 = vector.load %arg2[%c0, %c0_1] : memref<8x128xf32, #tpu.memory_space<vmem>>, vector<8x128xf32>
    %cst = arith.constant 0.000000e+00 : f32
    %4 = vector.broadcast %cst : f32 to vector<8x128xf32>
    %5 = arith.cmpf ogt, %3, %4 : vector<8x128xf32>
    %6 = arith.extui %5 : vector<8x128xi1> to vector<8x128xi32>
    %7 = arith.sitofp %6 : vector<8x128xi32> to vector<8x128xf32>
    %c0_2 = arith.constant 0 : index
    %c0_3 = arith.constant 0 : index
    %8 = vector.load %arg3[%c0_2, %c0_3] : memref<8x128xf32, #tpu.memory_space<vmem>>, vector<8x128xf32>
    %c0_4 = arith.constant 0 : index
    %c0_5 = arith.constant 0 : index
    %c0_6 = arith.constant 0 : index
    %9 = vector.load %arg4[%c0_4, %c0_5, %c0_6] : memref<1x8x128xf32, #tpu.memory_space<vmem>>, vector<1x8x128xf32>
    %10 = vector.shape_cast %9 : vector<1x8x128xf32> to vector<8x128xf32>
    %11 = arith.mulf %8, %7 : vector<8x128xf32>
    %12 = vector.shape_cast %11 : vector<8x128xf32> to vector<1x8x128xf32>
    %cst_7 = arith.constant dense<0.000000e+00> : vector<8x128xf32>
    %13 = vector.multi_reduction <add>, %12, %cst_7 [0] : vector<1x8x128xf32> to vector<8x128xf32>
    %14 = arith.addf %10, %13 : vector<8x128xf32>
    %c0_8 = arith.constant 0 : index
    %c0_9 = arith.constant 0 : index
    %c0_10 = arith.constant 0 : index
    %15 = vector.load %arg4[%c0_8, %c0_9, %c0_10] : memref<1x8x128xf32, #tpu.memory_space<vmem>>, vector<1x8x128xf32>
    %16 = vector.shape_cast %15 : vector<1x8x128xf32> to vector<8x128xf32>
    %17 = vector.shape_cast %14 : vector<8x128xf32> to vector<1x8x128xf32>
    tpu.vector_store %arg4[%c0_8, %c0_9, %c0_10], %17 {strides = array<i32>} : memref<1x8x128xf32, #tpu.memory_space<vmem>>, vector<1x8x128xf32>,
    %c0_11 = arith.constant 0 : index
    %c0_12 = arith.constant 0 : index
    %c0_13 = arith.constant 0 : index
    %18 = vector.load %arg5[%c0_11, %c0_12, %c0_13] : memref<1x8x128xf32, #tpu.memory_space<vmem>>, vector<1x8x128xf32>
    %19 = vector.shape_cast %18 : vector<1x8x128xf32> to vector<8x128xf32>
    %20 = vector.shape_cast %7 : vector<8x128xf32> to vector<1x8x128xf32>
    %cst_14 = arith.constant dense<0.000000e+00> : vector<8x128xf32>
    %21 = vector.multi_reduction <add>, %20, %cst_14 [0] : vector<1x8x128xf32> to vector<8x128xf32>
    %22 = arith.addf %19, %21 : vector<8x128xf32>
    %c0_15 = arith.constant 0 : index
    %c0_16 = arith.constant 0 : index
    %c0_17 = arith.constant 0 : index
    %23 = vector.load %arg5[%c0_15, %c0_16, %c0_17] : memref<1x8x128xf32, #tpu.memory_space<vmem>>, vector<1x8x128xf32>
    %24 = vector.shape_cast %23 : vector<1x8x128xf32> to vector<8x128xf32>
    %25 = vector.shape_cast %22 : vector<8x128xf32> to vector<1x8x128xf32>
    tpu.vector_store %arg5[%c0_15, %c0_16, %c0_17], %25 {strides = array<i32>} : memref<1x8x128xf32, #tpu.memory_space<vmem>>, vector<1x8x128xf32>,
    %c0_18 = arith.constant 0 : index
    %c0_19 = arith.constant 0 : index
    %c0_20 = arith.constant 0 : index
    %26 = vector.load %arg6[%c0_18, %c0_19, %c0_20] : memref<1x8x128xf32, #tpu.memory_space<vmem>>, vector<1x8x128xf32>
    %27 = vector.shape_cast %26 : vector<1x8x128xf32> to vector<8x128xf32>
    %28 = vector.shape_cast %8 : vector<8x128xf32> to vector<1x8x128xf32>
    %cst_21 = arith.constant dense<0.000000e+00> : vector<8x128xf32>
    %29 = vector.multi_reduction <add>, %28, %cst_21 [0] : vector<1x8x128xf32> to vector<8x128xf32>
    %30 = arith.addf %27, %29 : vector<8x128xf32>
    %c0_22 = arith.constant 0 : index
    %c0_23 = arith.constant 0 : index
    %c0_24 = arith.constant 0 : index
    %31 = vector.load %arg6[%c0_22, %c0_23, %c0_24] : memref<1x8x128xf32, #tpu.memory_space<vmem>>, vector<1x8x128xf32>
    %32 = vector.shape_cast %31 : vector<1x8x128xf32> to vector<8x128xf32>
    %33 = vector.shape_cast %30 : vector<8x128xf32> to vector<1x8x128xf32>
    tpu.vector_store %arg6[%c0_22, %c0_23, %c0_24], %33 {strides = array<i32>} : memref<1x8x128xf32, #tpu.memory_space<vmem>>, vector<1x8x128xf32>,
    return
  }
  func.func @transform_0(%arg0: i32, %arg1: i32) -> (i32, i32) {
    %c1_i32 = arith.constant 1 : i32
    %0 = arith.muli %arg0, %c1_i32 : i32
    %1 = arith.addi %0, %arg1 : i32
    %c0_i32 = arith.constant 0 : i32
    %c0_i32_0 = arith.constant 0 : i32
    return %1, %c0_i32 : i32, i32
  }
  func.func @transform_1(%arg0: i32, %arg1: i32) -> (i32, i32) {
    %c1_i32 = arith.constant 1 : i32
    %0 = arith.muli %arg0, %c1_i32 : i32
    %1 = arith.addi %0, %arg1 : i32
    %c0_i32 = arith.constant 0 : i32
    %c0_i32_0 = arith.constant 0 : i32
    return %1, %c0_i32 : i32, i32
  }
  func.func @transform_2(%arg0: i32, %arg1: i32) -> (i32, i32, i32) {
    %c0_i32 = arith.constant 0 : i32
    %c0_i32_0 = arith.constant 0 : i32
    %c0_i32_1 = arith.constant 0 : i32
    return %arg0, %c0_i32, %c0_i32_0 : i32, i32, i32
  }
  func.func @transform_3(%arg0: i32, %arg1: i32) -> (i32, i32, i32) {
    %c0_i32 = arith.constant 0 : i32
    %c0_i32_0 = arith.constant 0 : i32
    %c0_i32_1 = arith.constant 0 : i32
    return %arg0, %c0_i32, %c0_i32_0 : i32, i32, i32
  }
  func.func @transform_4(%arg0: i32, %arg1: i32) -> (i32, i32, i32) {
    %c0_i32 = arith.constant 0 : i32
    %c0_i32_0 = arith.constant 0 : i32
    %c0_i32_1 = arith.constant 0 : i32
    return %arg0, %c0_i32, %c0_i32_0 : i32, i32, i32
  }
}

</mosaic_0001>

<bundles_post_ra>
// kernel: fscore_metric.1
= control target key start
LH: loop header
LB: loop body
LE: loop exit
PB: predicated region body
PF: predicated region fallthrough
CT: control target
= control target key end

     0   :  { %s505_s15 = smov 0   ;;  %s507_s16 = smov 0   ;;  %s540_s0 = inlined_call_operand.vmem [shape: f32[16,128], index: 0, kind: input, shape index: {}]   ;;  %s541_s1 = inlined_call_operand.vmem [shape: f32[16,128], index: 1, kind: input, shape index: {}]   ;;  %s542_s2 = inlined_call_operand.vmem [shape: f32[2,8,128], index: 2, kind: output, shape index: {0}]   ;;  %s543_s3 = inlined_call_operand.vmem [shape: f32[2,8,128], index: 3, kind: output, shape index: {1}]   ;;  %s544_s4 = inlined_call_operand.vmem [shape: f32[2,8,128], index: 4, kind: output, shape index: {2}]  }
   0x1   :  { %s509_s17 = smov 0  }
   0x2 LB: > { %s27_s18 = sadd.s32 1, %s473_s16  ;;  %p421_p0 = scmp.ge.s32.totalorder %s477_s17, 1  ;;  %s477_s17 = sphi %s509_s17, %s15_s17   ;;  %s473_s16 = sphi %s507_s16, %s546_s16   ;;  %s469_s15 = sphi %s505_s15, %s545_s15  }
   0x3   : > { %p29_p1 = scmp.ge.s32.totalorder %s27_s18, 2  ;;  %p195_p2 = scmp.lt.s32.totalorder %s477_s17, 3 }
   0x5   : > { %s548_s18 = smov (%p29_p1, %s27_s18), 0  ;;  %p196_p3 = pnand %p421_p0, %p195_p2 }
   0x6   : > { %p234_p4 = scmp.lt.s32.totalorder (!%p196_p3), %s469_s15, 1 }
   0x7   : > { %199 = sbr.rel (%p196_p3) target bundleno = 21 (0x15), region = 28 }
   0xc   : > { %s550_s15 = smov (!%p234_p4, %s469_s15), 1  ;;  %v479_v2 = vmov 0.0  }
   0xd   : > { %s422_s19 = sshll.u32 %s550_s15, 3 }
   0xe   : > { %s237_s22 = scalar_lea.vmem %s540_s0, %s422_s19  ;;  %s243_s25 = scalar_lea.vmem %s541_s1, %s422_s19 }
   0xf   : > { %v264_v0 = vld [vmem:[%s237_s22] sm:$0xff]  ;;  %s256_s28 = scalar_lea.vmem %s544_s4, %s422_s19  ;;  %s252_s5 = scalar_lea.vmem %s543_s3, %s422_s19 }
  0x10   : > { %vm265_vm0 = vcmp.gt.f32.partialorder %v264_v0, 0.0  ;;  %v268_v1 = vld [vmem:[%s243_s25] sm:$0xff]  ;;  %s248_s8 = scalar_lea.vmem %s542_s2, %s422_s19 }
  0x11   : > { %v427_v3 = vsel %vm265_vm0, 1.0, %v479_v2  ;;  %281 = vst [vmem:[%s256_s28] sm:$0xff] %v268_v1 }
  0x12   : > { %v270_v4 = vmul.f32 %v427_v3, %v268_v1  ;;  %277 = vst [vmem:[%s252_s5] sm:$0xff] %v427_v3 }
  0x14   : > { %273 = vst [vmem:[%s248_s8] sm:$0xff] %v270_v4 }
  0x15 PF: > { %s15_s17 = sadd.s32 1, %s477_s17   ;;  %s545_s15 = smov %s473_s16 }
  0x16   : > { %p12_p5 = scmp.ge.s32.totalorder %s15_s17, 4   ;;  %s546_s16 = smov %s548_s18 }
  0x18   :  { %14 = sbr.rel (!%p12_p5) target bundleno = 2 (0x2), region = 89 }

</bundles_post_ra>
